<compile_context>
chip_gen: v7x
topology: tpu7x:2x2x1
jax: 0.10.0
libtpu: 0.0.40
codegen_flags: <defaults>
</compile_context>

<pallas_src>
import jax
import jax.numpy as jnp
from jax.experimental import pallas as pl
from jax.experimental.pallas import tpu as pltpu


def _lstm_cell_kernel(z_ref, c_ref, w_ref, b_ref, ht_ref, ct_ref):
    """One (hidden-column-tile, batch-tile) block of the LSTM cell.

    z_ref  : (TB, D+H)   bf16  -- [x | h_prev]
    c_ref  : (TB, TH)    f32   -- c_prev tile
    w_ref  : (D+H, 4*TH) bf16  -- [W;U] columns, gates interleaved per tile,
                                  i/f/o columns pre-scaled by 0.5
    b_ref  : (1, 4*TH)   f32   -- biases, i/f/o pre-scaled by 0.5
    ht_ref, ct_ref : (TB, TH) f32
    """
    th = ct_ref.shape[1]

    # Single MXU dot: (TB, D+H) x (D+H, 4*TH) -> (TB, 4*TH), f32 accumulation.
    z = jnp.dot(z_ref[...], w_ref[...], preferred_element_type=jnp.float32)
    z = z + b_ref[...]

    # sigmoid(v) == 0.5 + 0.5*tanh(0.5*v); the 0.5*v was folded into the
    # weights/bias, so one tanh over the whole block handles all four gates.
    t = jnp.tanh(z)
    i_t = 0.5 + 0.5 * t[:, 0 * th:1 * th]
    f_t = 0.5 + 0.5 * t[:, 1 * th:2 * th]
    g_t = t[:, 2 * th:3 * th]
    o_t = 0.5 + 0.5 * t[:, 3 * th:4 * th]

    c_t = f_t * c_ref[...] + i_t * g_t
    h_t = o_t * jnp.tanh(c_t)

    ct_ref[...] = c_t.astype(ct_ref.dtype)
    ht_ref[...] = h_t.astype(ht_ref.dtype)


def _pick_tile(dim, candidates):
    for c in candidates:
        if c <= dim and dim % c == 0:
            return c
    return dim


def lstm_cell_forward(x, h_prev, c_prev, w4, u4, b4, *, tb=None, th=None):
    """Pallas LSTM cell.

    x  : (B, D)        h_prev, c_prev : (B, H)
    w4 : (4, D, H)     u4 : (4, H, H)     b4 : (4, H)
    Gate order along the leading axis is (i, f, c, o).
    Returns (h_t, c_t), both (B, H) float32.
    """
    B, D = x.shape
    H = h_prev.shape[1]
    K = D + H

    if tb is None:
        tb = _pick_tile(B, (256, 128, 64, 32, 16, 8))
    if th is None:
        # Largest lane-aligned hidden-column tile whose double-buffered working
        # set stays well inside even the v7x (64 MiB/TC) VMEM budget.
        for cand in (512, 256, 128):
            if H % cand == 0:
                working = 2 * (K * 4 * cand * 2        # W tile (bf16)
                               + tb * K * 2            # z tile (bf16)
                               + 3 * tb * cand * 4     # c_prev + h_t + c_t (f32)
                               + 4 * cand * 4)         # bias (f32)
                if working <= 24 * 1024 * 1024:
                    th = cand
                    break
        if th is None:
            th = 128 if H % 128 == 0 else H
    nt = H // th  # th always divides H (or th == H in the fallback)

    gate_scale = jnp.array([0.5, 0.5, 1.0, 0.5], dtype=jnp.float32)  # (i,f,c,o)

    # ---- layout plumbing (wrapper side, done once per call) ----
    # W_cat[:, j*4*th + g*th + c] == [W;U][g, :, j*th + c] so that one column
    # tile of W_cat carries all four gates for hidden-column tile j.
    wu = jnp.concatenate([w4, u4], axis=1) * gate_scale[:, None, None]  # (4,K,H)
    w_cat = (wu.reshape(4, K, nt, th)
               .transpose(1, 2, 0, 3)
               .reshape(K, 4 * H)
               .astype(jnp.bfloat16))
    b_cat = ((b4 * gate_scale[:, None]).reshape(4, nt, th)
             .transpose(1, 0, 2)
             .reshape(1, 4 * H)
             .astype(jnp.float32))
    z = jnp.concatenate([x, h_prev], axis=1).astype(jnp.bfloat16)       # (B, K)
    c_prev = c_prev.astype(jnp.float32)

    # Hidden tiles OUTER -> weight tile stays VMEM-resident across batch tiles.
    grid = (nt, pl.cdiv(B, tb))

    in_specs = [
        pl.BlockSpec((tb, K), lambda j, i: (i, 0)),          # z = [x | h_prev]
        pl.BlockSpec((tb, th), lambda j, i: (i, j)),         # c_prev
        pl.BlockSpec((K, 4 * th), lambda j, i: (0, j)),      # W_cat (all gates)
        pl.BlockSpec((1, 4 * th), lambda j, i: (0, j)),      # b_cat
    ]
    out_specs = (
        pl.BlockSpec((tb, th), lambda j, i: (i, j)),         # h_t
        pl.BlockSpec((tb, th), lambda j, i: (i, j)),         # c_t
    )

    flops = 2 * B * K * 4 * H + 10 * B * H
    bytes_accessed = (2 * (z.size + w_cat.size)               # bf16 operands
                      + 4 * (b_cat.size + c_prev.size + 2 * B * H))
    cost = pl.CostEstimate(flops=flops,
                           transcendentals=5 * B * H,         # 4 gate tanh + cell tanh
                           bytes_accessed=bytes_accessed)

    return pl.pallas_call(
        _lstm_cell_kernel,
        out_shape=(jax.ShapeDtypeStruct((B, H), jnp.float32),
                   jax.ShapeDtypeStruct((B, H), jnp.float32)),
        grid=grid,
        in_specs=in_specs,
        out_specs=out_specs,
        compiler_params=pltpu.CompilerParams(
            dimension_semantics=("parallel", "parallel"),
            vmem_limit_bytes=48 * 1024 * 1024,
        ),
        cost_estimate=cost,
    )(z, c_prev, w_cat, b_cat)


def lstm_cell_reference(x, h_prev, c_prev, w4, u4, b4, matmul_dtype=jnp.float32):
    """Pure-JAX reference of the module math (optionally bf16 matmul operands)."""
    xm = x.astype(matmul_dtype)
    hm = h_prev.astype(matmul_dtype)

    def gate(g):
        return (jnp.dot(xm, w4[g].astype(matmul_dtype),
                        preferred_element_type=jnp.float32)
                + jnp.dot(hm, u4[g].astype(matmul_dtype),
                          preferred_element_type=jnp.float32)
                + b4[g])

    i_t = jax.nn.sigmoid(gate(0))
    f_t = jax.nn.sigmoid(gate(1))
    g_t = jnp.tanh(gate(2))
    o_t = jax.nn.sigmoid(gate(3))
    c_t = f_t * c_prev + i_t * g_t
    h_t = o_t * jnp.tanh(c_t)
    return h_t, c_t


if __name__ == "__main__":
    key = jax.random.PRNGKey(0)
    k_x, k_h, k_c, k_w, k_u = jax.random.split(key, 5)

    # Small shapes consistent with the module: batch=16, input_size=128,
    # hidden_size=384 (three 128-wide hidden tiles exercise the interleaved
    # gate layout and the 2-D grid).
    B, D, H = 16, 128, 384

    x = jax.random.normal(k_x, (B, D), dtype=jnp.float32)
    h_prev = jax.random.normal(k_h, (B, H), dtype=jnp.float32)
    c_prev = jax.random.normal(k_c, (B, H), dtype=jnp.float32)

    # xavier_uniform_ weights (as in init_weights), zero biases; gates stacked
    # on a leading axis in order (i, f, c, o).
    bw = (6.0 / (D + H)) ** 0.5
    bu = (6.0 / (H + H)) ** 0.5
    w4 = jax.random.uniform(k_w, (4, D, H), jnp.float32, minval=-bw, maxval=bw)
    u4 = jax.random.uniform(k_u, (4, H, H), jnp.float32, minval=-bu, maxval=bu)
    b4 = jnp.zeros((4, H), jnp.float32)

    h_t, c_t = jax.block_until_ready(
        lstm_cell_forward(x, h_prev, c_prev, w4, u4, b4))

    assert h_t.shape == (B, H) and c_t.shape == (B, H)
    assert h_t.dtype == jnp.float32 and c_t.dtype == jnp.float32

    # Tight check against a reference using the same bf16 matmul operands
    # (isolates kernel arithmetic from the bf16 quantization of inputs).
    h_bf, c_bf = lstm_cell_reference(x, h_prev, c_prev, w4, u4, b4,
                                     matmul_dtype=jnp.bfloat16)
    assert jnp.allclose(h_t, h_bf, atol=2e-3, rtol=0.0), "h_t mismatch (bf16 ref)"
    assert jnp.allclose(c_t, c_bf, atol=2e-3, rtol=0.0), "c_t mismatch (bf16 ref)"

    # Loose check against the full-f32 module math (only difference is the
    # bf16 quantization of the matmul operands).
    h_f32, c_f32 = lstm_cell_reference(x, h_prev, c_prev, w4, u4, b4)
    assert jnp.allclose(h_t, h_f32, atol=5e-2, rtol=0.0), "h_t mismatch (f32 ref)"
    assert jnp.allclose(c_t, c_f32, atol=5e-2, rtol=0.0), "c_t mismatch (f32 ref)"

    print("KERNEL_OK")
</pallas_src>

<mosaic_0001>
module attributes {stable_mosaic.version = 11 : i64} {
  func.func @_lstm_cell_kernel(%arg0: i32, %arg1: i32, %arg2: memref<16x512xbf16, #tpu.memory_space<vmem>>, %arg3: memref<16x128xf32, #tpu.memory_space<vmem>>, %arg4: memref<512x512xbf16, #tpu.memory_space<vmem>>, %arg5: memref<1x512xf32, #tpu.memory_space<vmem>>, %arg6: memref<16x128xf32, #tpu.memory_space<vmem>>, %arg7: memref<16x128xf32, #tpu.memory_space<vmem>>) attributes {dimension_semantics = [#tpu.dimension_semantics<parallel>, #tpu.dimension_semantics<parallel>], iteration_bounds = array<i64: 3, 1>, scalar_prefetch = 0 : i64, scratch_operands = 0 : i64, tpu.core_type = #tpu.core_type<tc>, window_params = [{transform_indices = @transform_0, window_bounds = array<i64: 16, 512>}, {transform_indices = @transform_1, window_bounds = array<i64: 16, 128>}, {transform_indices = @transform_2, window_bounds = array<i64: 512, 512>}, {transform_indices = @transform_3, window_bounds = array<i64: 1, 512>}, {transform_indices = @transform_4, window_bounds = array<i64: 16, 128>}, {transform_indices = @transform_5, window_bounds = array<i64: 16, 128>}]} {
    %c0 = arith.constant 0 : index
    %c0_0 = arith.constant 0 : index
    %0 = vector.load %arg2[%c0, %c0_0] : memref<16x512xbf16, #tpu.memory_space<vmem>>, vector<16x512xbf16>
    %c0_1 = arith.constant 0 : index
    %c0_2 = arith.constant 0 : index
    %1 = vector.load %arg4[%c0_1, %c0_2] : memref<512x512xbf16, #tpu.memory_space<vmem>>, vector<512x512xbf16>
    %cst = arith.constant dense<0.000000e+00> : vector<16x512xf32>
    %2 = tpu.matmul %0, %1, %cst {dimension_numbers = #tpu.dot_dimension_numbers<[1], [0], [0], [1], [0, 0, 1, 1], [], []>} : vector<16x512xbf16>, vector<512x512xbf16>, vector<16x512xf32> -> vector<16x512xf32>
    %c0_3 = arith.constant 0 : index
    %c0_4 = arith.constant 0 : index
    %3 = vector.load %arg5[%c0_3, %c0_4] : memref<1x512xf32, #tpu.memory_space<vmem>>, vector<1x512xf32>
    %4 = vector.broadcast %3 : vector<1x512xf32> to vector<16x512xf32>
    %5 = arith.addf %2, %4 : vector<16x512xf32>
    %6 = math.tanh %5 : vector<16x512xf32>
    %7 = vector.extract_strided_slice %6 {offsets = [0, 0], sizes = [16, 128], strides = [1, 1]} : vector<16x512xf32> to vector<16x128xf32>
    %cst_5 = arith.constant 5.000000e-01 : f32
    %8 = vector.broadcast %cst_5 : f32 to vector<16x128xf32>
    %9 = arith.mulf %8, %7 : vector<16x128xf32>
    %cst_6 = arith.constant 5.000000e-01 : f32
    %10 = vector.broadcast %cst_6 : f32 to vector<16x128xf32>
    %11 = arith.addf %10, %9 : vector<16x128xf32>
    %12 = vector.extract_strided_slice %6 {offsets = [0, 128], sizes = [16, 128], strides = [1, 1]} : vector<16x512xf32> to vector<16x128xf32>
    %cst_7 = arith.constant 5.000000e-01 : f32
    %13 = vector.broadcast %cst_7 : f32 to vector<16x128xf32>
    %14 = arith.mulf %13, %12 : vector<16x128xf32>
    %cst_8 = arith.constant 5.000000e-01 : f32
    %15 = vector.broadcast %cst_8 : f32 to vector<16x128xf32>
    %16 = arith.addf %15, %14 : vector<16x128xf32>
    %17 = vector.extract_strided_slice %6 {offsets = [0, 256], sizes = [16, 128], strides = [1, 1]} : vector<16x512xf32> to vector<16x128xf32>
    %18 = vector.extract_strided_slice %6 {offsets = [0, 384], sizes = [16, 128], strides = [1, 1]} : vector<16x512xf32> to vector<16x128xf32>
    %cst_9 = arith.constant 5.000000e-01 : f32
    %19 = vector.broadcast %cst_9 : f32 to vector<16x128xf32>
    %20 = arith.mulf %19, %18 : vector<16x128xf32>
    %cst_10 = arith.constant 5.000000e-01 : f32
    %21 = vector.broadcast %cst_10 : f32 to vector<16x128xf32>
    %22 = arith.addf %21, %20 : vector<16x128xf32>
    %c0_11 = arith.constant 0 : index
    %c0_12 = arith.constant 0 : index
    %23 = vector.load %arg3[%c0_11, %c0_12] : memref<16x128xf32, #tpu.memory_space<vmem>>, vector<16x128xf32>
    %24 = arith.mulf %16, %23 : vector<16x128xf32>
    %25 = arith.mulf %11, %17 : vector<16x128xf32>
    %26 = arith.addf %24, %25 : vector<16x128xf32>
    %27 = math.tanh %26 : vector<16x128xf32>
    %28 = arith.mulf %22, %27 : vector<16x128xf32>
    %c0_13 = arith.constant 0 : index
    %c0_14 = arith.constant 0 : index
    %29 = vector.load %arg7[%c0_13, %c0_14] : memref<16x128xf32, #tpu.memory_space<vmem>>, vector<16x128xf32>
    tpu.vector_store %arg7[%c0_13, %c0_14], %26 {strides = array<i32>} : memref<16x128xf32, #tpu.memory_space<vmem>>, vector<16x128xf32>,
    %c0_15 = arith.constant 0 : index
    %c0_16 = arith.constant 0 : index
    %30 = vector.load %arg6[%c0_15, %c0_16] : memref<16x128xf32, #tpu.memory_space<vmem>>, vector<16x128xf32>
    tpu.vector_store %arg6[%c0_15, %c0_16], %28 {strides = array<i32>} : memref<16x128xf32, #tpu.memory_space<vmem>>, vector<16x128xf32>,
    return
  }
  func.func @transform_0(%arg0: i32, %arg1: i32) -> (i32, i32) {
    %c0_i32 = arith.constant 0 : i32
    %c0_i32_0 = arith.constant 0 : i32
    return %arg1, %c0_i32 : i32, i32
  }
  func.func @transform_1(%arg0: i32, %arg1: i32) -> (i32, i32) {
    %c0_i32 = arith.constant 0 : i32
    return %arg1, %arg0 : i32, i32
  }
  func.func @transform_2(%arg0: i32, %arg1: i32) -> (i32, i32) {
    %c0_i32 = arith.constant 0 : i32
    %c0_i32_0 = arith.constant 0 : i32
    return %c0_i32, %arg0 : i32, i32
  }
  func.func @transform_3(%arg0: i32, %arg1: i32) -> (i32, i32) {
    %c0_i32 = arith.constant 0 : i32
    %c0_i32_0 = arith.constant 0 : i32
    return %c0_i32, %arg0 : i32, i32
  }
  func.func @transform_4(%arg0: i32, %arg1: i32) -> (i32, i32) {
    %c0_i32 = arith.constant 0 : i32
    return %arg1, %arg0 : i32, i32
  }
  func.func @transform_5(%arg0: i32, %arg1: i32) -> (i32, i32) {
    %c0_i32 = arith.constant 0 : i32
    return %arg1, %arg0 : i32, i32
  }
}

</mosaic_0001>

<bundles_post_ra>
// kernel: tpu_custom_call.1
= control target key start
LH: loop header
LB: loop body
LE: loop exit
PB: predicated region body
PF: predicated region fallthrough
CT: control target
= control target key end

     0   :  { %s2869_s0 = inlined_call_operand.hbm [shape: bf16[16,512], index: 0, kind: input, shape index: {}]   ;;  %s2870_s1 = inlined_call_operand.hbm [shape: f32[16,384], index: 1, kind: input, shape index: {}]   ;;  %s2871_s2 = inlined_call_operand.hbm [shape: bf16[512,1536], index: 2, kind: input, shape index: {}]   ;;  %s2872_s3 = inlined_call_operand.hbm [shape: f32[1,1536], index: 3, kind: input, shape index: {}]   ;;  %s2873_s4 = inlined_call_operand.hbm [shape: f32[16,384], index: 4, kind: output, shape index: {0}]   ;;  %s2874_s5 = inlined_call_operand.hbm [shape: f32[16,384], index: 5, kind: output, shape index: {1}]  }
   0x1   :  { %2888 = sst [smem:[#allocation23_spill]] %s2870_s1 }
   0x2   :  { %11 = vsyncpa [#allocation3], 0 }
   0x3   :  { %12 = vsyncpa [#allocation6], 0 }
   0x4   :  { %14 = vsyncpa [#allocation6 + $0x1], 0 }
   0x5   :  { %15 = vsyncpa [#allocation9], 0 }
   0x6   :  { %17 = vsyncpa [#allocation9 + $0x1], 0 }
   0x7   :  { %18 = vsyncpa [#allocation4], 0 }
   0x8   :  { %20 = vsyncpa [#allocation4 + $0x1], 0 }
   0x9   :  { %21 = vsyncpa [#allocation12], 0 }
   0xa   :  { %23 = vsyncpa [#allocation12 + $0x1], 0  ;;  %s2394_s18 = smov 0   ;;  %s2396_s19 = smov 0  }
   0xb   :  { %s2398_s20 = smov 0   ;;  %s2400_s21 = smov 0  }
   0xc   :  { %s2402_s22 = smov 0   ;;  %s2404_s23 = smov 0  }
   0xd LB: > { %2889 = sst [smem:[#allocation18_spill]] %s2327_s18  ;;  %s41_s24 = sadd.s32 1, %s2343_s22  ;;  %s2347_s23 = sphi %s2404_s23, %s29_s23   ;;  %s2343_s22 = sphi %s2402_s22, %s2920_s22   ;;  %s2339_s21 = sphi %s2400_s21, %s2919_s21   ;;  %s2335_s20 = sphi %s2398_s20, %s2915_s20   ;;  %s2331_s19 = sphi %s2396_s19, %s2918_s19   ;;  %s2327_s18 = sphi %s2394_s18, %s2917_s18  }
   0xe   : > { %2890 = sst [smem:[#allocation19_spill]] %s2335_s20  ;;  %s76_s25 = sadd.s32 1, %s2335_s20 }
   0xf   : > { %p43_p0 = scmp.ge.s32.totalorder %s41_s24, 3  ;;  %p2875_p1 = scmp.ne.s32.totalorder %s2335_s20, %s2331_s19 }
  0x10   : > { %p84_p2 = scmp.eq.s32.totalorder %s2347_s23, 0  ;;  %p1828_p4 = scmp.lt.s32.totalorder %s2347_s23, 3 }
  0x11   : > { %s2922_s24 = smov (%p43_p0, %s41_s24), 0  ;;  %s238_s27 = sand.u32 1, %s2347_s23  }
  0x12   : > { %2891 = sst [smem:[#allocation20_spill]] %s2922_s24  ;;  %p85_p3 = por %p84_p2, %p2875_p1 }
  0x13   : > { %s72_s26 = ssub.s32 %s2343_s22, %s2922_s24  ;;  %s2439_s28 = sand.u32 1, %s2335_s20  }
  0x14   : > { %p74_p5 = scmp.eq.s32.totalorder %s72_s26, 0  ;;  %s1622_s29 = sshll.u32 %s2343_s22, 7 }
  0x15   : > { %s1621_s6 = sshll.u32 %s2439_s28, 4  ;;  %s2893_s1 = sld [smem:[#allocation23_spill]] }
  0x16   : > { %s2443_s30 = scalar_select %p74_p5, %s2335_s20, %s76_s25  }
  0x17   : > { %p2451_p6 = pnand %p1828_p4, %p85_p3  ;;  %s242_s11 = scalar_lea.vmem [#allocation5], %s1621_s6 }
  0x18   : > { %2892 = sst [smem:[#allocation21_spill]] %s2443_s30  ;;  %s251_s12 = sshll.u32 %s242_s11, 4  ;;  %s2455_s12 = int_to_ptr.vmem [resolvable:$true] %s251_s12 }
  0x19   : > { %s2894_s10 = scalar_select %p2451_p6, 1, 0 }
  0x1a   : > { %s2457_s13 = scalar_lea.sflag [#allocation6], %s238_s27  ;;  %p2463_p8 = pneg %p2451_p6 }
  0x1b   : > { %s2449_s9 = scalar_lea.hbm %s2893_s1, %s1622_s29  ;;  %s2112_s25 = scalar_lea.hbm %s2893_s1, 768 }
  0x1c   : > { %s2107_s14 = scalar_lea.hbm %s2449_s9, 256  ;;  %p2113_p11 = scmp.lt.u32.totalorder %s2449_s9, %s2893_s1 }
  0x1d   : > { %p2108_p7 = scmp.ne.s32.totalorder %s2449_s9, %s2107_s14  ;;  %p2114_p12 = scmp.lt.u32.totalorder %s2112_s25, %s2107_s14 }
  0x1e   : > { %s2895_s15 = scalar_select %p2463_p8, 1, 0 }
  0x1f   : > { %p2110_p9 = pnand %p2463_p8, %p2108_p7  ;;  %p2115_p13 = por %p2114_p12, %p2113_p11 }
  0x20   : > { %p2116_p0 = scmp.lt.u32.totalorder %s2107_s14, %s2449_s9 }
  0x21   : > { %p2111_p10 = pneg %p2110_p9 }
  0x22   : > { %p2117_p2 = por %p2116_p0, %p2115_p13 }
  0x24   : > { %p2118_p3 = pnand %p2117_p2, %p2111_p10 }
  0x26   : > { %2121 = shalt.err (!%p2118_p3)
}
  0x27   : > { %s2122_s27 = scalar_lea.vmem %s2455_s12, 256  ;;  %s2349_s6 = smov [#allocation5]  }
  0x28   : > { %p2123_p4 = scmp.ne.s32.totalorder %s2455_s12, %s2122_s27  ;;  %s2127_s7 = sshll.u32 %s2349_s6, 4  ;;  %s2128_s7 = int_to_ptr.vmem [resolvable:$false] %s2127_s7 }
  0x29   : > { %s2129_s8 = scalar_lea.vmem %s2128_s7, 512  ;;  %p2130_p9 = scmp.lt.s32.totalorder %s2455_s12, %s2128_s7 }
  0x2a   : > { %p2125_p5 = pnand %p2123_p4, %p2463_p8  ;;  %p2131_p1 = scmp.lt.s32.totalorder %s2129_s8, %s2122_s27 }
  0x2c   : > { %p2126_p7 = pneg %p2125_p5  ;;  %p2132_p11 = por %p2131_p1, %p2130_p9 }
  0x2e   : > { %p2133_p12 = pnand %p2132_p11, %p2126_p7 }
  0x30   : > { %2136 = shalt.err (!%p2133_p12)
}
  0x31   : > { %s2350_s11 = smov 384   ;;  %s2351_s14 = smov 128  }
  0x32   : > { %s2352_s16 = smov 8   ;;  %s2488_s17 = sadd.s32 4294967295, %s2347_s23  }
  0x33   : > { %1813 = dma.hbm_to_vmem [thread:$0]  (!%p2451_p6), %s2449_s9, 256, %s2455_s12, %s2457_s13, %s2350_s11, %s2351_s14, %s2352_s16  }
  0x34   : > { %s1617_s25 = sadd.s32 4294967294, %s2347_s23   ;;  %p89_p1 = scmp.ne.s32.totalorder %s2331_s19, %s2327_s18 }
  0x35   : > { %p2880_p10 = scmp.eq.s32.totalorder %s2488_s17, 0  ;;  %p167_p13 = scmp.eq.s32.totalorder %s2488_s17, 2 }
  0x36   : > { %p173_p0 = scmp.eq.s32.totalorder %s1617_s25, 2  ;;  %p1618_p3 = scmp.ge.s32.totalorder %s2347_s23, 1 }
  0x37   : > { %p2497_p2 = por %p2880_p10, %p89_p1  ;;  %p2897_p4 = scmp.ne.s32.totalorder %s2335_s20, %s2331_s19 }
  0x38   : > { %p2509_p7 = por %p173_p0, %p89_p1  ;;  %p208_p9 = scmp.lt.s32.totalorder %s2347_s23, 4 }
  0x39   : > { %s2896_s26 = scalar_select %p2497_p2, 1, 0 }
  0x3a   : > { %p2505_p5 = por %p167_p13, %p2897_p4  ;;  %p2514_p11 = pnand %p1618_p3, %p208_p9 }
  0x3b   : > { %s2899_s12 = scalar_select %p2509_p7, 1, 0 }
  0x3c   : > { %s2898_s9 = scalar_select %p2505_p5, 1, 0 }
  0x3d   : > { %2900 = sst [smem:[#allocation22_spill]] %s2899_s12  ;;  %s2353_s27 = smov [#allocation2]  }
  0x3e   : > { %s2901_s29 = scalar_select %p2514_p11, 1, 0 }
  0x3f   : > { %s224_s6 = sshll.u32 %s2353_s27, 4  ;;  %p1806_p12 = pneg %p2514_p11  ;;  %s2518_s6 = int_to_ptr.vmem [resolvable:$true] %s224_s6 }
  0x40   : > { %s1623_s7 = sshll.u32 %s2439_s28, 10  ;;  %s1774_s8 = sshll.u32 %s2343_s22, 8 }
  0x41   : > { %p2526_p13 = pnand %p1806_p12, %p2880_p10  ;;  %s2533_s25 = scalar_lea.hbm %s2871_s2, %s1774_s8 }
  0x42   : > { %s265_s1 = scalar_lea.vmem [#allocation7], %s1623_s7  ;;  %s2137_s20 = scalar_lea.hbm %s2869_s0, 512 }
  0x43   : > { %s272_s24 = sshll.u32 %s265_s1, 4  ;;  %p2138_p1 = scmp.ne.s32.totalorder %s2869_s0, %s2137_s20  ;;  %s2535_s24 = int_to_ptr.vmem [resolvable:$true] %s272_s24 }
  0x44   : > { %p2139_p0 = pneg %p2526_p13  ;;  %p2144_p9 = scmp.lt.u32.totalorder %s2137_s20, %s2869_s0 }
  0x46   : > { %p2140_p3 = pnand %p2139_p0, %p2138_p1 }
  0x48   : > { %p2141_p4 = pneg %p2140_p3 }
  0x4a   : > { %p2146_p12 = pnand %p2144_p9, %p2141_p4 }
  0x4c   : > { %2149 = shalt.err (!%p2146_p12)
}
  0x4d   : > { %s2150_s1 = scalar_lea.vmem %s2518_s6, 512  ;;  %p2158_p2 = scmp.lt.s32.totalorder %s2518_s6, %s2518_s6 }
  0x4e   : > { %p2151_p10 = scmp.ne.s32.totalorder %s2518_s6, %s2150_s1  ;;  %p2159_p11 = scmp.lt.s32.totalorder %s2150_s1, %s2150_s1 }
  0x50   : > { %p2153_p7 = pnand %p2151_p10, %p2139_p0  ;;  %p2160_p6 = por %p2159_p11, %p2158_p2 }
  0x52   : > { %p2154_p5 = pneg %p2153_p7 }
  0x54   : > { %p2161_p8 = pnand %p2160_p6, %p2154_p5 }
  0x56   : > { %2164 = shalt.err (!%p2161_p8)
}
  0x57   : > { %s2354_s18 = smov 256   ;;  %s2355_s20 = smov 16  }
  0x58   : > { %1809 = dma.hbm_to_vmem [thread:$0]  (!%p2526_p13), %s2869_s0, 512, %s2518_s6, [#allocation3], %s2354_s18, %s2354_s18, %s2355_s20  }
  0x59   : > { %s2165_s7 = scalar_lea.hbm %s2533_s25, 16384  ;;  %p2903_p8 = scmp.ne.s32.totalorder %s2895_s15, 0 }
  0x5a   : > { %p2166_p6 = scmp.ne.s32.totalorder %s2533_s25, %s2165_s7  ;;  %s2170_s14 = scalar_lea.hbm %s2871_s2, 49152 }
  0x5b   : > { %p2171_p5 = scmp.lt.u32.totalorder %s2533_s25, %s2871_s2  ;;  %p2172_p7 = scmp.lt.u32.totalorder %s2170_s14, %s2165_s7 }
  0x5c   : > { %p2168_p10 = pnand %p2166_p6, %p2903_p8  ;;  %p2174_p1 = scmp.lt.u32.totalorder %s2165_s7, %s2533_s25 }
  0x5d   : > { %p2173_p11 = por %p2172_p7, %p2171_p5 }
  0x5e   : > { %p2169_p2 = pneg %p2168_p10 }
  0x5f   : > { %p2175_p0 = por %p2174_p1, %p2173_p11 }
  0x61   : > { %p2176_p3 = pnand %p2175_p0, %p2169_p2 }
  0x63   : > { %2179 = shalt.err (!%p2176_p3)
}
  0x64   : > { %s2180_s6 = scalar_lea.vmem %s2535_s24, 16384  ;;  %s2356_s11 = smov [#allocation7]  }
  0x65   : > { %p2181_p13 = scmp.ne.s32.totalorder %s2535_s24, %s2180_s6  ;;  %s2185_s30 = sshll.u32 %s2356_s11, 4  ;;  %s2186_s30 = int_to_ptr.vmem [resolvable:$false] %s2185_s30 }
  0x66   : > { %s2187_s12 = scalar_lea.vmem %s2186_s30, 32768  ;;  %p2188_p12 = scmp.lt.s32.totalorder %s2535_s24, %s2186_s30 }
  0x67   : > { %p2183_p4 = pnand %p2181_p13, %p2903_p8  ;;  %p2189_p6 = scmp.lt.s32.totalorder %s2187_s12, %s2180_s6 }
  0x69   : > { %p2184_p9 = pneg %p2183_p4  ;;  %p2190_p10 = por %p2189_p6, %p2188_p12 }
  0x6b   : > { %p2191_p5 = pnand %p2190_p10, %p2184_p9 }
  0x6d   : > { %2194 = shalt.err (!%p2191_p5)
}
  0x6e   : > { %s2357_s7 = smov 768   ;;  %p2904_p2 = scmp.ne.s32.totalorder %s2894_s10, 0 }
  0x6f   : > { %s1626_s8 = sshll.u32 %s2439_s28, 2  ;;  %s1775_s27 = sshll.u32 %s2343_s22, 6 }
  0x70   : > { %1816 = dma.hbm_to_vmem [thread:$0]  (!%p2904_p2), %s2533_s25, 16384, %s2535_s24, %s2457_s13, %s2357_s7, %s2354_s18, %s2355_s20  }
  0x71   : > { %s2590_s1 = scalar_lea.hbm %s2872_s3, %s1775_s27  ;;  %s286_s6 = scalar_lea.vmem [#allocation8], %s1626_s8 }
  0x72   : > { %s294_s11 = sshll.u32 %s286_s6, 4  ;;  %s283_s30 = scalar_lea.sflag [#allocation9], %s2439_s28  ;;  %s295_s11 = int_to_ptr.vmem [resolvable:$true] %s294_s11 }
  0x73   : > { %s2195_s12 = scalar_lea.hbm %s2590_s1, 64  ;;  %s2200_s25 = scalar_lea.hbm %s2872_s3, 192 }
  0x74   : > { %p2196_p7 = scmp.ne.s32.totalorder %s2590_s1, %s2195_s12  ;;  %p2201_p0 = scmp.lt.u32.totalorder %s2590_s1, %s2872_s3 }
  0x75   : > { %p2202_p3 = scmp.lt.u32.totalorder %s2200_s25, %s2195_s12  ;;  %p2204_p4 = scmp.lt.u32.totalorder %s2195_s12, %s2590_s1 }
  0x76   : > { %p2198_p11 = pnand %p2196_p7, %p2903_p8 }
  0x77   : > { %p2203_p13 = por %p2202_p3, %p2201_p0 }
  0x78   : > { %p2199_p1 = pneg %p2198_p11 }
  0x79   : > { %p2205_p9 = por %p2204_p4, %p2203_p13 }
  0x7b   : > { %p2206_p12 = pnand %p2205_p9, %p2199_p1 }
  0x7d   : > { %2209 = shalt.err (!%p2206_p12)
}
  0x7e   : > { %s2210_s28 = scalar_lea.vmem %s295_s11, 64  ;;  %s2358_s7 = smov [#allocation8]  }
  0x7f   : > { %p2211_p6 = scmp.ne.s32.totalorder %s295_s11, %s2210_s28  ;;  %s2215_s8 = sshll.u32 %s2358_s7, 4  ;;  %s2216_s8 = int_to_ptr.vmem [resolvable:$false] %s2215_s8 }
  0x80   : > { %s2217_s27 = scalar_lea.vmem %s2216_s8, 128  ;;  %p2218_p7 = scmp.lt.s32.totalorder %s295_s11, %s2216_s8 }
  0x81   : > { %p2213_p10 = pnand %p2211_p6, %p2903_p8  ;;  %p2219_p11 = scmp.lt.s32.totalorder %s2217_s27, %s2210_s28 }
  0x83   : > { %p2214_p5 = pneg %p2213_p10  ;;  %p2220_p2 = por %p2219_p11, %p2218_p7 }
  0x85   : > { %p2221_p0 = pnand %p2220_p2, %p2214_p5 }
  0x87   : > { %2224 = shalt.err (!%p2221_p0)
}
  0x88   : > { %p2905_p3 = scmp.ne.s32.totalorder %s2894_s10, 0  ;;  %p2906_p1 = scmp.ne.s32.totalorder %s2901_s29, 0 }
  0x89   : > { %p2907_p13 = scmp.eq.s32.totalorder (!%p2906_p1), %s2488_s17, 0 }
  0x8a   : > { %1819 = dma.hbm_to_vmem [thread:$0]  (!%p2905_p3), %s2590_s1, 64, %s295_s11, %s283_s30  }
  0x8b   : > { %303 = sbr.rel (%p2906_p1) target bundleno = 562 (0x232), region = 36 }
  0x92   : > { %2306 = dma.done.wait (%p2907_p13), [#allocation3], 512   ;;  %p2908_p8 = pmov %p2907_p13 }
  0x93   : > { %s309_s15 = sand.u32 1, %s2488_s17   ;;  %s2618_s14 = sand.u32 1, %s2331_s19  }
  0x94   : > { %2308 = vsyncadd (%p2908_p8), [#allocation3], 4294966784  ;;  %s2621_s16 = sshll.u32 %s2618_s14, 4  ;;  %s310_s10 = scalar_lea.sflag [#allocation6], %s309_s15 }
  0x95   : > { %s313_s1 = scalar_lea.vmem [#allocation5], %s2621_s16  ;;  %p2909_p2 = scmp.ne.s32.totalorder %s2896_s26, 0 }
  0x97   : > { %2310 = dma.done.wait (%p2909_p2), %s310_s10, 16640  }
  0x98   : > { %2312 = vsyncadd (%p2909_p2), %s310_s10, 4294950656  ;;  %s1632_s29 = sshll.u32 %s2618_s14, 10  ;;  %s1633_s6 = sshll.u32 %s2618_s14, 2 }
  0x99   : > { %s2630_s17 = scalar_lea.vmem [#allocation7], %s1632_s29  ;;  %s328_s11 = scalar_lea.sflag [#allocation9], %s2618_s14 }
  0x9a   : > { %s2633_s30 = scalar_lea.vmem [#allocation8], %s1633_s6 }
  0x9b   : > { %2314 = dma.done.wait (%p2909_p2), %s328_s11, 64  }
  0x9c   : > { %2316 = vsyncadd (%p2909_p2), %s328_s11, 4294967232  ;;  %v1889_v0 = vld [vmem:[%s2630_s17 + $0x4] ss:$16 sps:$4 sm:$0xff]   ;;  %v1891_v1 = vld [vmem:[%s2630_s17 + $0xc] ss:$16 sps:$4 sm:$0xff]   ;;  %s372_s26 = scalar_lea.vmem [#allocation11], %s2621_s16 }
  0x9d   : > { %1193 = vmatprep.subr.bf16.mxu0 %v1889_v0  ;;  %v1893_v2 = vld [vmem:[%s2630_s17] ss:$16 sps:$4 sm:$0xff]   ;;  %v1894_v3 = vld [vmem:[%s2630_s17 + $0x8] ss:$16 sps:$4 sm:$0xff]   ;;  %1279 = vmatprep.subr.bf16.mxu1 %v1891_v1  ;;  %v1895_v4 = vld [vmem:[%s2630_s17 + $0x24] ss:$16 sps:$4 sm:$0xff]  }
  0x9e   : > { %1194 = vmatpush1.bf16.msra.mxu0 %v1893_v2  ;;  %1280 = vmatpush1.bf16.msra.mxu1 %v1894_v3  ;;  %v1897_v5 = vld [vmem:[%s2630_s17 + $0x2c] ss:$16 sps:$4 sm:$0xff]   ;;  %v1899_v6 = vld [vmem:[%s2630_s17 + $0x20] ss:$16 sps:$4 sm:$0xff]   ;;  %v1900_v7 = vld [vmem:[%s2630_s17 + $0x28] ss:$16 sps:$4 sm:$0xff]  }
  0x9f   : > { %1195 = vmatprep.subr.bf16.mxu0 %v1895_v4  ;;  %1281 = vmatprep.subr.bf16.mxu1 %v1897_v5  ;;  %v1901_v8 = vld [vmem:[%s2630_s17 + $0x44] ss:$16 sps:$4 sm:$0xff]   ;;  %v1903_v9 = vld [vmem:[%s2630_s17 + $0x4c] ss:$16 sps:$4 sm:$0xff]   ;;  %v1905_v10 = vld [vmem:[%s2630_s17 + $0x40] ss:$16 sps:$4 sm:$0xff]  }
  0xa0   : > { %v1906_v11 = vld [vmem:[%s2630_s17 + $0x48] ss:$16 sps:$4 sm:$0xff]   ;;  %v1907_v12 = vld [vmem:[%s2630_s17 + $0x64] ss:$16 sps:$4 sm:$0xff]   ;;  %v1909_v13 = vld [vmem:[%s2630_s17 + $0x6c] ss:$16 sps:$4 sm:$0xff]  }
  0xa1   : > { %v1911_v14 = vld [vmem:[%s2630_s17 + $0x60] ss:$16 sps:$4 sm:$0xff]   ;;  %v1912_v15 = vld [vmem:[%s2630_s17 + $0x68] ss:$16 sps:$4 sm:$0xff]   ;;  %v1913_v16 = vld [vmem:[%s2630_s17 + $0x84] ss:$16 sps:$4 sm:$0xff]  }
  0xa2   : > { %1196 = vmatpush1.bf16.msra.mxu0 %v1899_v6  ;;  %1282 = vmatpush1.bf16.msra.mxu1 %v1900_v7  ;;  %v1915_v17 = vld [vmem:[%s2630_s17 + $0x8c] ss:$16 sps:$4 sm:$0xff]   ;;  %v1917_v18 = vld [vmem:[%s2630_s17 + $0x80] ss:$16 sps:$4 sm:$0xff]   ;;  %v1918_v19 = vld [vmem:[%s2630_s17 + $0x88] ss:$16 sps:$4 sm:$0xff]  }
  0xa3   : > { %1197 = vmatprep.subr.bf16.mxu0 %v1901_v8  ;;  %1283 = vmatprep.subr.bf16.mxu1 %v1903_v9  ;;  %v1919_v20 = vld [vmem:[%s2630_s17 + $0xa4] ss:$16 sps:$4 sm:$0xff]   ;;  %v1921_v21 = vld [vmem:[%s2630_s17 + $0xac] ss:$16 sps:$4 sm:$0xff]   ;;  %v1923_v22 = vld [vmem:[%s2630_s17 + $0xa0] ss:$16 sps:$4 sm:$0xff]  }
  0xa4   : > { %v1924_v23 = vld [vmem:[%s2630_s17 + $0xa8] ss:$16 sps:$4 sm:$0xff]   ;;  %v1925_v24 = vld [vmem:[%s2630_s17 + $0xc4] ss:$16 sps:$4 sm:$0xff]   ;;  %v1927_v25 = vld [vmem:[%s2630_s17 + $0xcc] ss:$16 sps:$4 sm:$0xff]  }
  0xa5   : > { %v1929_v26 = vld [vmem:[%s2630_s17 + $0xc0] ss:$16 sps:$4 sm:$0xff]   ;;  %v1930_v27 = vld [vmem:[%s2630_s17 + $0xc8] ss:$16 sps:$4 sm:$0xff]   ;;  %v1931_v28 = vld [vmem:[%s2630_s17 + $0xe4] ss:$16 sps:$4 sm:$0xff]  }
  0xa6   : > { %1198 = vmatpush1.bf16.msra.mxu0 %v1905_v10  ;;  %1284 = vmatpush1.bf16.msra.mxu1 %v1906_v11  ;;  %v1933_v29 = vld [vmem:[%s2630_s17 + $0xec] ss:$16 sps:$4 sm:$0xff]   ;;  %v1935_v30 = vld [vmem:[%s2630_s17 + $0xe0] ss:$16 sps:$4 sm:$0xff]   ;;  %v1936_v31 = vld [vmem:[%s2630_s17 + $0xe8] ss:$16 sps:$4 sm:$0xff]  }
  0xa7   : > { %1199 = vmatprep.subr.bf16.mxu0 %v1907_v12  ;;  %1285 = vmatprep.subr.bf16.mxu1 %v1909_v13  ;;  %v1937_v32 = vld [vmem:[%s2630_s17 + $0x104] ss:$16 sps:$4 sm:$0xff]   ;;  %v1939_v33 = vld [vmem:[%s2630_s17 + $0x10c] ss:$16 sps:$4 sm:$0xff]   ;;  %v1941_v34 = vld [vmem:[%s2630_s17 + $0x100] ss:$16 sps:$4 sm:$0xff]  }
  0xa8   : > { %v1942_v35 = vld [vmem:[%s2630_s17 + $0x108] ss:$16 sps:$4 sm:$0xff]   ;;  %v1943_v36 = vld [vmem:[%s2630_s17 + $0x124] ss:$16 sps:$4 sm:$0xff]   ;;  %v1945_v37 = vld [vmem:[%s2630_s17 + $0x12c] ss:$16 sps:$4 sm:$0xff]  }
  0xa9   : > { %v1947_v38 = vld [vmem:[%s2630_s17 + $0x120] ss:$16 sps:$4 sm:$0xff]   ;;  %v1948_v39 = vld [vmem:[%s2630_s17 + $0x128] ss:$16 sps:$4 sm:$0xff]   ;;  %v1949_v40 = vld [vmem:[%s2630_s17 + $0x144] ss:$16 sps:$4 sm:$0xff]  }
  0xaa   : > { %1200 = vmatpush1.bf16.msra.mxu0 %v1911_v14  ;;  %1286 = vmatpush1.bf16.msra.mxu1 %v1912_v15  ;;  %v1951_v41 = vld [vmem:[%s2630_s17 + $0x14c] ss:$16 sps:$4 sm:$0xff]   ;;  %v1953_v42 = vld [vmem:[%s2630_s17 + $0x140] ss:$16 sps:$4 sm:$0xff]   ;;  %v1954_v43 = vld [vmem:[%s2630_s17 + $0x148] ss:$16 sps:$4 sm:$0xff]  }
  0xab   : > { %1201 = vmatprep.subr.bf16.mxu0 %v1913_v16  ;;  %1287 = vmatprep.subr.bf16.mxu1 %v1915_v17  ;;  %v1955_v44 = vld [vmem:[%s2630_s17 + $0x164] ss:$16 sps:$4 sm:$0xff]   ;;  %v1957_v45 = vld [vmem:[%s2630_s17 + $0x16c] ss:$16 sps:$4 sm:$0xff]   ;;  %v1959_v46 = vld [vmem:[%s2630_s17 + $0x160] ss:$16 sps:$4 sm:$0xff]  }
  0xac   : > { %v1960_v47 = vld [vmem:[%s2630_s17 + $0x168] ss:$16 sps:$4 sm:$0xff]   ;;  %v1987_v48 = vld [vmem:[#allocation2 + $0x4] ss:$16 sps:$4 sm:$0xff]   ;;  %v1963_v50 = vld [vmem:[%s2630_s17 + $0x18c] ss:$16 sps:$4 sm:$0xff]  }
  0xad   : > { %v1961_v49 = vld [vmem:[%s2630_s17 + $0x184] ss:$16 sps:$4 sm:$0xff]   ;;  %1225 = vmatprep.mubr.bf16.mxu0 %v1987_v48  ;;  %1311 = vmatprep.mubr.bf16.mxu1 %v1987_v48  ;;  %v1965_v51 = vld [vmem:[%s2630_s17 + $0x180] ss:$16 sps:$4 sm:$0xff]   ;;  %v1966_v52 = vld [vmem:[%s2630_s17 + $0x188] ss:$16 sps:$4 sm:$0xff]  }
  0xae   : > { %1202 = vmatpush1.bf16.msra.mxu0 %v1917_v18  ;;  %1288 = vmatpush1.bf16.msra.mxu1 %v1918_v19  ;;  %v1967_v53 = vld [vmem:[%s2630_s17 + $0x1a4] ss:$16 sps:$4 sm:$0xff]   ;;  %v1969_v54 = vld [vmem:[%s2630_s17 + $0x1ac] ss:$16 sps:$4 sm:$0xff]   ;;  %v1971_v55 = vld [vmem:[%s2630_s17 + $0x1a0] ss:$16 sps:$4 sm:$0xff]  }
  0xaf   : > { %1203 = vmatprep.subr.bf16.mxu0 %v1919_v20  ;;  %1289 = vmatprep.subr.bf16.mxu1 %v1921_v21  ;;  %v1972_v56 = vld [vmem:[%s2630_s17 + $0x1a8] ss:$16 sps:$4 sm:$0xff]   ;;  %v1973_v57 = vld [vmem:[%s2630_s17 + $0x1c4] ss:$16 sps:$4 sm:$0xff]   ;;  %v1975_v58 = vld [vmem:[%s2630_s17 + $0x1cc] ss:$16 sps:$4 sm:$0xff]  }
  0xb0   : > { %v1977_v59 = vld [vmem:[%s2630_s17 + $0x1c0] ss:$16 sps:$4 sm:$0xff]   ;;  %v1978_v60 = vld [vmem:[%s2630_s17 + $0x1c8] ss:$16 sps:$4 sm:$0xff]   ;;  %v1979_v61 = vld [vmem:[%s2630_s17 + $0x1e4] ss:$16 sps:$4 sm:$0xff]  }
  0xb1   : > { %v1981_v62 = vld [vmem:[%s2630_s17 + $0x1ec] ss:$16 sps:$4 sm:$0xff]   ;;  %v1983_v63 = vld [vmem:[%s2630_s17 + $0x1e0] ss:$16 sps:$4 sm:$0xff]   ;;  %v1984_v0 = vld [vmem:[%s2630_s17 + $0x1e8] ss:$16 sps:$4 sm:$0xff]  }
  0xb2   : > { %1204 = vmatpush1.bf16.msra.mxu0 %v1923_v22  ;;  %1290 = vmatpush1.bf16.msra.mxu1 %v1924_v23  ;;  %v1990_v1 = vld [vmem:[%s2630_s17 + $0x204] ss:$16 sps:$4 sm:$0xff]   ;;  %v1993_v2 = vld [vmem:[%s2630_s17 + $0x20c] ss:$16 sps:$4 sm:$0xff]   ;;  %v1985_v3 = vld [vmem:[#allocation2] ss:$16 sps:$4 sm:$0xff]  }
  0xb3   : > { %1205 = vmatprep.subr.bf16.mxu0 %v1925_v24  ;;  %1291 = vmatprep.subr.bf16.mxu1 %v1927_v25  ;;  %v1988_v4 = vld [vmem:[%s2630_s17 + $0x200] ss:$16 sps:$4 sm:$0xff]   ;;  %v1991_v5 = vld [vmem:[%s2630_s17 + $0x208] ss:$16 sps:$4 sm:$0xff]   ;;  %v1996_v6 = vld [vmem:[%s2630_s17 + $0x224] ss:$16 sps:$4 sm:$0xff]  }
  0xb4   : > { %v1999_v7 = vld [vmem:[%s2630_s17 + $0x22c] ss:$16 sps:$4 sm:$0xff]   ;;  %v1994_v8 = vld [vmem:[%s2630_s17 + $0x220] ss:$16 sps:$4 sm:$0xff]   ;;  %v1997_v9 = vld [vmem:[%s2630_s17 + $0x228] ss:$16 sps:$4 sm:$0xff]  }
  0xb5   : > { %v2002_v10 = vld [vmem:[%s2630_s17 + $0x244] ss:$16 sps:$4 sm:$0xff]   ;;  %v2005_v11 = vld [vmem:[%s2630_s17 + $0x24c] ss:$16 sps:$4 sm:$0xff]   ;;  %v2000_v12 = vld [vmem:[%s2630_s17 + $0x240] ss:$16 sps:$4 sm:$0xff]  }
  0xb6   : > { %1206 = vmatpush1.bf16.msra.mxu0 %v1929_v26  ;;  %1292 = vmatpush1.bf16.msra.mxu1 %v1930_v27  ;;  %v2003_v13 = vld [vmem:[%s2630_s17 + $0x248] ss:$16 sps:$4 sm:$0xff]   ;;  %v2008_v14 = vld [vmem:[%s2630_s17 + $0x264] ss:$16 sps:$4 sm:$0xff]   ;;  %v2011_v15 = vld [vmem:[%s2630_s17 + $0x26c] ss:$16 sps:$4 sm:$0xff]  }
  0xb7   : > { %1207 = vmatprep.subr.bf16.mxu0 %v1931_v28  ;;  %1293 = vmatprep.subr.bf16.mxu1 %v1933_v29  ;;  %v2006_v16 = vld [vmem:[%s2630_s17 + $0x260] ss:$16 sps:$4 sm:$0xff]   ;;  %v2009_v17 = vld [vmem:[%s2630_s17 + $0x268] ss:$16 sps:$4 sm:$0xff]   ;;  %v2014_v18 = vld [vmem:[%s2630_s17 + $0x284] ss:$16 sps:$4 sm:$0xff]  }
  0xb8   : > { %v2017_v19 = vld [vmem:[%s2630_s17 + $0x28c] ss:$16 sps:$4 sm:$0xff]   ;;  %v2012_v20 = vld [vmem:[%s2630_s17 + $0x280] ss:$16 sps:$4 sm:$0xff]   ;;  %v2015_v21 = vld [vmem:[%s2630_s17 + $0x288] ss:$16 sps:$4 sm:$0xff]  }
  0xb9   : > { %v2020_v22 = vld [vmem:[%s2630_s17 + $0x2a4] ss:$16 sps:$4 sm:$0xff]   ;;  %v2023_v23 = vld [vmem:[%s2630_s17 + $0x2ac] ss:$16 sps:$4 sm:$0xff]   ;;  %v2018_v24 = vld [vmem:[%s2630_s17 + $0x2a0] ss:$16 sps:$4 sm:$0xff]  }
  0xba   : > { %1208 = vmatpush1.bf16.msra.mxu0 %v1935_v30  ;;  %1294 = vmatpush1.bf16.msra.mxu1 %v1936_v31  ;;  %v2021_v25 = vld [vmem:[%s2630_s17 + $0x2a8] ss:$16 sps:$4 sm:$0xff]   ;;  %v2026_v26 = vld [vmem:[%s2630_s17 + $0x2c4] ss:$16 sps:$4 sm:$0xff]   ;;  %v2029_v27 = vld [vmem:[%s2630_s17 + $0x2cc] ss:$16 sps:$4 sm:$0xff]  }
  0xbb   : > { %1209 = vmatprep.subr.bf16.mxu0 %v1937_v32  ;;  %1295 = vmatprep.subr.bf16.mxu1 %v1939_v33  ;;  %v2086_v28 = vld [vmem:[#allocation2 + $0xc] ss:$16 sps:$4 sm:$0xff]   ;;  %v2024_v29 = vld [vmem:[%s2630_s17 + $0x2c0] ss:$16 sps:$4 sm:$0xff]   ;;  %v2027_v30 = vld [vmem:[%s2630_s17 + $0x2c8] ss:$16 sps:$4 sm:$0xff]  }
  0xbc   : > { %v2032_v31 = vld [vmem:[%s2630_s17 + $0x2e4] ss:$16 sps:$4 sm:$0xff]   ;;  %v2035_v32 = vld [vmem:[%s2630_s17 + $0x2ec] ss:$16 sps:$4 sm:$0xff]   ;;  %v2030_v33 = vld [vmem:[%s2630_s17 + $0x2e0] ss:$16 sps:$4 sm:$0xff]  }
  0xbd   : > { %v2059_v48 = vld [vmem:[%s2630_s17 + $0x36c] ss:$16 sps:$4 sm:$0xff]   ;;  %s1440_s12 = sshll.u32 %s372_s26, 4  ;;  %s1770_s24 = sshll.u32 %s2339_s21, 7  ;;  %s2774_s12 = int_to_ptr.vmem [resolvable:$true] %s1440_s12 }
  0xbe   : > { %1210 = vmatpush1.bf16.msra.mxu0 %v1941_v34  ;;  %1296 = vmatpush1.bf16.msra.mxu1 %v1942_v35  ;;  %v2033_v34 = vld [vmem:[%s2630_s17 + $0x2e8] ss:$16 sps:$4 sm:$0xff]   ;;  %v2038_v35 = vld [vmem:[%s2630_s17 + $0x304] ss:$16 sps:$4 sm:$0xff]   ;;  %s2781_s18 = scalar_lea.hbm %s2874_s5, %s1770_s24  ;;  %s1407_s20 = scalar_lea.sflag [#allocation12], %s2618_s14 }
  0xbf   : > { %1211 = vmatprep.subr.bf16.mxu0 %v1943_v36  ;;  %1297 = vmatprep.subr.bf16.mxu1 %v1945_v37  ;;  %v2041_v36 = vld [vmem:[%s2630_s17 + $0x30c] ss:$16 sps:$4 sm:$0xff]   ;;  %v2036_v37 = vld [vmem:[%s2630_s17 + $0x300] ss:$16 sps:$4 sm:$0xff]   ;;  %s2225_s28 = scalar_lea.vmem %s2774_s12, 256  ;;  %p2910_p9 = scmp.ne.s32.totalorder %s2898_s9, 0 }
  0xc0   : > { %p2226_p4 = scmp.ne.s32.totalorder %s2774_s12, %s2225_s28  ;;  %s2359_s7 = smov [#allocation11]  }
  0xc1   : > { %s2229_s8 = sshll.u32 %s2359_s7, 4  ;;  %s2230_s8 = int_to_ptr.vmem [resolvable:$false] %s2229_s8 }
  0xc2   : > { %1212 = vmatpush1.bf16.msra.mxu0 %v1947_v38  ;;  %1298 = vmatpush1.bf16.msra.mxu1 %v1948_v39  ;;  %v2039_v38 = vld [vmem:[%s2630_s17 + $0x308] ss:$16 sps:$4 sm:$0xff]   ;;  %v2044_v39 = vld [vmem:[%s2630_s17 + $0x324] ss:$16 sps:$4 sm:$0xff]   ;;  %p2227_p12 = pnand %p2226_p4, %p2910_p9  ;;  %s2231_s27 = scalar_lea.vmem %s2230_s8, 512 }
  0xc3   : > { %1213 = vmatprep.subr.bf16.mxu0 %v1949_v40  ;;  %1299 = vmatprep.subr.bf16.mxu1 %v1951_v41  ;;  %v2047_v40 = vld [vmem:[%s2630_s17 + $0x32c] ss:$16 sps:$4 sm:$0xff]   ;;  %v2042_v41 = vld [vmem:[%s2630_s17 + $0x320] ss:$16 sps:$4 sm:$0xff]   ;;  %p2232_p10 = scmp.lt.s32.totalorder %s2774_s12, %s2230_s8  ;;  %p2233_p5 = scmp.lt.s32.totalorder %s2231_s27, %s2225_s28 }
  0xc4   : > { %p2228_p6 = pneg %p2227_p12 }
  0xc5   : > { %p2234_p7 = por %p2233_p5, %p2232_p10 }
  0xc6   : > { %1214 = vmatpush1.bf16.msra.mxu0 %v1953_v42  ;;  %1300 = vmatpush1.bf16.msra.mxu1 %v1954_v43  ;;  %v2045_v42 = vld [vmem:[%s2630_s17 + $0x328] ss:$16 sps:$4 sm:$0xff]   ;;  %v2050_v43 = vld [vmem:[%s2630_s17 + $0x344] ss:$16 sps:$4 sm:$0xff]  }
  0xc7   : > { %1215 = vmatprep.subr.bf16.mxu0 %v1955_v44  ;;  %1301 = vmatprep.subr.bf16.mxu1 %v1957_v45  ;;  %v2053_v44 = vld [vmem:[%s2630_s17 + $0x34c] ss:$16 sps:$4 sm:$0xff]   ;;  %v2048_v45 = vld [vmem:[%s2630_s17 + $0x340] ss:$16 sps:$4 sm:$0xff]   ;;  %p2235_p11 = pnand %p2234_p7, %p2228_p6 }
  0xca   : > { %1216 = vmatpush1.bf16.msra.mxu0 %v1959_v46  ;;  %1302 = vmatpush1.bf16.msra.mxu1 %v1960_v47  ;;  %v2051_v46 = vld [vmem:[%s2630_s17 + $0x348] ss:$16 sps:$4 sm:$0xff]   ;;  %v2056_v47 = vld [vmem:[%s2630_s17 + $0x364] ss:$16 sps:$4 sm:$0xff]  }
  0xcb   : > { %1217 = vmatprep.subr.bf16.mxu0 %v1961_v49  ;;  %1303 = vmatprep.subr.bf16.mxu1 %v1963_v50  ;;  %v2054_v49 = vld [vmem:[%s2630_s17 + $0x360] ss:$16 sps:$4 sm:$0xff]   ;;  %v2057_v50 = vld [vmem:[%s2630_s17 + $0x368] ss:$16 sps:$4 sm:$0xff]  }
  0xce   : > { %1218 = vmatpush1.bf16.msra.mxu0 %v1965_v51  ;;  %1304 = vmatpush1.bf16.msra.mxu1 %v1966_v52  ;;  %v2062_v51 = vld [vmem:[%s2630_s17 + $0x384] ss:$16 sps:$4 sm:$0xff]   ;;  %v2065_v52 = vld [vmem:[%s2630_s17 + $0x38c] ss:$16 sps:$4 sm:$0xff]  }
  0xcf   : > { %1219 = vmatprep.subr.bf16.mxu0 %v1967_v53  ;;  %1305 = vmatprep.subr.bf16.mxu1 %v1969_v54  ;;  %v2060_v53 = vld [vmem:[%s2630_s17 + $0x380] ss:$16 sps:$4 sm:$0xff]   ;;  %v2063_v54 = vld [vmem:[%s2630_s17 + $0x388] ss:$16 sps:$4 sm:$0xff]  }
  0xd2   : > { %1220 = vmatpush1.bf16.msra.mxu0 %v1971_v55  ;;  %1306 = vmatpush1.bf16.msra.mxu1 %v1972_v56  ;;  %v2068_v55 = vld [vmem:[%s2630_s17 + $0x3a4] ss:$16 sps:$4 sm:$0xff]   ;;  %v2071_v56 = vld [vmem:[%s2630_s17 + $0x3ac] ss:$16 sps:$4 sm:$0xff]  }
  0xd3   : > { %1221 = vmatprep.subr.bf16.mxu0 %v1973_v57  ;;  %1307 = vmatprep.subr.bf16.mxu1 %v1975_v58  ;;  %v2066_v57 = vld [vmem:[%s2630_s17 + $0x3a0] ss:$16 sps:$4 sm:$0xff]   ;;  %v2069_v58 = vld [vmem:[%s2630_s17 + $0x3a8] ss:$16 sps:$4 sm:$0xff]  }
  0xd6   : > { %1222 = vmatpush1.bf16.msra.mxu0 %v1977_v59  ;;  %1308 = vmatpush1.bf16.msra.mxu1 %v1978_v60  ;;  %v2074_v59 = vld [vmem:[%s2630_s17 + $0x3c4] ss:$16 sps:$4 sm:$0xff]   ;;  %v2077_v60 = vld [vmem:[%s2630_s17 + $0x3cc] ss:$16 sps:$4 sm:$0xff]  }
  0xd7   : > { %1223 = vmatprep.subr.bf16.mxu0 %v1979_v61  ;;  %1309 = vmatprep.subr.bf16.mxu1 %v1981_v62  ;;  %v2072_v61 = vld [vmem:[%s2630_s17 + $0x3c0] ss:$16 sps:$4 sm:$0xff]   ;;  %v2075_v62 = vld [vmem:[%s2630_s17 + $0x3c8] ss:$16 sps:$4 sm:$0xff]  }
  0xda   : > { %1224 = vmatpush1.bf16.msra.mxu0 %v1983_v63  ;;  %1310 = vmatpush1.bf16.msra.mxu1 %v1984_v0  ;;  %v2080_v63 = vld [vmem:[%s2630_s17 + $0x3e4] ss:$16 sps:$4 sm:$0xff]   ;;  %v2083_v0 = vld [vmem:[%s2630_s17 + $0x3ec] ss:$16 sps:$4 sm:$0xff]  }
  0xdb   : > { %1236 = vmatprep.subr.bf16.mxu0 %v1990_v1  ;;  %1322 = vmatprep.subr.bf16.mxu1 %v1993_v2  ;;  %v2078_v1 = vld [vmem:[%s2630_s17 + $0x3e0] ss:$16 sps:$4 sm:$0xff]   ;;  %v2081_v2 = vld [vmem:[%s2630_s17 + $0x3e8] ss:$16 sps:$4 sm:$0xff]  }
  0xdd   : > { %1226 = vmatmul.mubr.bf16.vlgmr.msra.gmra.mrb[0].mxu0 %v1985_v3  ;;  %1312 = vmatmul.mubr.bf16.vlgmr.msra.gmra.mrb[0].mxu1 %v1985_v3  ;;  %v2084_v3 = vld [vmem:[#allocation2 + $0x8] ss:$16 sps:$4 sm:$0xff]  }
  0xde   : > { %1237 = vmatpush1.bf16.msra.mxu0 %v1988_v4  ;;  %1323 = vmatpush1.bf16.msra.mxu1 %v1991_v5  ;;  %v513_v4 = vlaneseq }
  0xdf   : > { %1238 = vmatprep.subr.bf16.mxu0 %v1996_v6  ;;  %1324 = vmatprep.subr.bf16.mxu1 %v1999_v7  ;;  %v511_v7 = vld [vmem:[%s2633_s30] sm:$0xf] }
  0xe0   : > { %1268 = vmatprep.mubr.bf16.mxu0 %v2086_v28  ;;  %1354 = vmatprep.mubr.bf16.mxu1 %v2086_v28  ;;  %v514_v5 = vshrl.u32 %v513_v4, 7 }
  0xe2   : > { %1239 = vmatpush1.bf16.msra.mxu0 %v1994_v8  ;;  %1325 = vmatpush1.bf16.msra.mxu1 %v1997_v9  ;;  %v515_v6 = vsub.s32 0, %v514_v5  ;;  %v523_v8 = vsub.s32 2, %v514_v5  ;;  %v519_v9 = vsub.s32 1, %v514_v5 }
  0xe3   : > { %1240 = vmatprep.subr.bf16.mxu0 %v2002_v10  ;;  %1326 = vmatprep.subr.bf16.mxu1 %v2005_v11 }
  0xe4   : > { %v516_v10 = vrot.slane %v511_v7, %v515_v6  ;;  %v524_v11 = vrot.slane %v511_v7, %v523_v8 }
  0xe6   : > { %1241 = vmatpush1.bf16.msra.mxu0 %v2000_v12  ;;  %1327 = vmatpush1.bf16.msra.mxu1 %v2003_v13  ;;  %v520_v12 = vrot.slane %v511_v7, %v519_v9 }
  0xe7   : > { %1242 = vmatprep.subr.bf16.mxu0 %v2008_v14  ;;  %1328 = vmatprep.subr.bf16.mxu1 %v2011_v15 }
  0xea   : > { %1243 = vmatpush1.bf16.msra.mxu0 %v2006_v16  ;;  %1329 = vmatpush1.bf16.msra.mxu1 %v2009_v17 }
  0xeb   : > { %1244 = vmatprep.subr.bf16.mxu0 %v2014_v18  ;;  %1330 = vmatprep.subr.bf16.mxu1 %v2017_v19 }
  0xee   : > { %1245 = vmatpush1.bf16.msra.mxu0 %v2012_v20  ;;  %1331 = vmatpush1.bf16.msra.mxu1 %v2015_v21 }
  0xef   : > { %1246 = vmatprep.subr.bf16.mxu0 %v2020_v22  ;;  %1332 = vmatprep.subr.bf16.mxu1 %v2023_v23 }
  0xf2   : > { %1247 = vmatpush1.bf16.msra.mxu0 %v2018_v24  ;;  %1333 = vmatpush1.bf16.msra.mxu1 %v2021_v25  ;;  %v527_v25 = vsub.s32 3, %v514_v5 }
  0xf3   : > { %1248 = vmatprep.subr.bf16.mxu0 %v2026_v26  ;;  %1334 = vmatprep.subr.bf16.mxu1 %v2029_v27 }
  0xf4   : > { %v528_v28 = vrot.slane %v511_v7, %v527_v25 }
  0xf6   : > { %1249 = vmatpush1.bf16.msra.mxu0 %v2024_v29  ;;  %1335 = vmatpush1.bf16.msra.mxu1 %v2027_v30 }
  0xf7   : > { %1250 = vmatprep.subr.bf16.mxu0 %v2032_v31  ;;  %1336 = vmatprep.subr.bf16.mxu1 %v2035_v32 }
  0xfa   : > { %1251 = vmatpush1.bf16.msra.mxu0 %v2030_v33  ;;  %1337 = vmatpush1.bf16.msra.mxu1 %v2033_v34 }
  0xfb   : > { %1252 = vmatprep.subr.bf16.mxu0 %v2038_v35  ;;  %1338 = vmatprep.subr.bf16.mxu1 %v2041_v36 }
  0xfe   : > { %1253 = vmatpush1.bf16.msra.mxu0 %v2036_v37  ;;  %1339 = vmatpush1.bf16.msra.mxu1 %v2039_v38  ;;  %v1385_v38 = vld [vmem:[%s313_s1] sm:$0xff] }
  0xff   : > { %1254 = vmatprep.subr.bf16.mxu0 %v2044_v39  ;;  %1340 = vmatprep.subr.bf16.mxu1 %v2047_v40 }
 0x102   : > { %1255 = vmatpush1.bf16.msra.mxu0 %v2042_v41  ;;  %1341 = vmatpush1.bf16.msra.mxu1 %v2045_v42 }
 0x103   : > { %1256 = vmatprep.subr.bf16.mxu0 %v2050_v43  ;;  %1342 = vmatprep.subr.bf16.mxu1 %v2053_v44 }
 0x106   : > { %1257 = vmatpush1.bf16.msra.mxu0 %v2048_v45  ;;  %1343 = vmatpush1.bf16.msra.mxu1 %v2051_v46 }
 0x107   : > { %1258 = vmatprep.subr.bf16.mxu0 %v2056_v47  ;;  %1344 = vmatprep.subr.bf16.mxu1 %v2059_v48  ;;  %v1386_v47 = vld [vmem:[%s313_s1 + $0x8] sm:$0xff] }
 0x10a   : > { %1259 = vmatpush1.bf16.msra.mxu0 %v2054_v49  ;;  %1345 = vmatpush1.bf16.msra.mxu1 %v2057_v50 }
 0x10b   : > { %1260 = vmatprep.subr.bf16.mxu0 %v2062_v51  ;;  %1346 = vmatprep.subr.bf16.mxu1 %v2065_v52 }
 0x10e   : > { %1261 = vmatpush1.bf16.msra.mxu0 %v2060_v53  ;;  %1347 = vmatpush1.bf16.msra.mxu1 %v2063_v54 }
 0x10f   : > { %1262 = vmatprep.subr.bf16.mxu0 %v2068_v55  ;;  %1348 = vmatprep.subr.bf16.mxu1 %v2071_v56 }
 0x112   : > { %1263 = vmatpush1.bf16.msra.mxu0 %v2066_v57  ;;  %1349 = vmatpush1.bf16.msra.mxu1 %v2069_v58 }
 0x113   : > { %1264 = vmatprep.subr.bf16.mxu0 %v2074_v59  ;;  %1350 = vmatprep.subr.bf16.mxu1 %v2077_v60 }
 0x116   : > { %1265 = vmatpush1.bf16.msra.mxu0 %v2072_v61  ;;  %1351 = vmatpush1.bf16.msra.mxu1 %v2075_v62 }
 0x117   : > { %1266 = vmatprep.subr.bf16.mxu0 %v2080_v63  ;;  %1352 = vmatprep.subr.bf16.mxu1 %v2083_v0 }
 0x11a   : > { %1267 = vmatpush1.bf16.msra.mxu0 %v2078_v1  ;;  %1353 = vmatpush1.bf16.msra.mxu1 %v2081_v2 }
 0x11d   : > { %1269 = vmatmul.mubr.bf16.vlgmr.msra.gmra.mrb[0].mxu0 %v2084_v3  ;;  %1355 = vmatmul.mubr.bf16.vlgmr.msra.gmra.mrb[0].mxu1 %v2084_v3 }
 0x1f0   : > { %v1270_v13 = vpop.f32.mrb[0].mxu0  ;;  %v1356_v14 = vpop.f32.mrb[0].mxu1 }
 0x1f1   : > { %v1776_v15 = vadd.f32 %v1270_v13, %v516_v10  ;;  %v1272_v16 = vpop.f32.mrb[1].mxu0  ;;  %v1358_v17 = vpop.f32.mrb[1].mxu1  ;;  %v1780_v18 = vadd.f32 %v1356_v14, %v524_v11 }
 0x1f2   : > { %v1777_v19 = vadd.f32 %v1272_v16, %v520_v12  ;;  %v1274_v20 = vpop.f32.mrb[2].mxu0  ;;  %v1360_v21 = vpop.f32.mrb[2].mxu1  ;;  %v1781_v29 = vadd.f32 %v1358_v17, %v528_v28 }
 0x1f3   : > { %2087 = vtanh.f32 %v1776_v15  ;;  %v1778_v22 = vadd.f32 %v1274_v20, %v516_v10  ;;  %v1276_v23 = vpop.f32.mrb[3].mxu0  ;;  %v1362_v24 = vpop.f32.mrb[3].mxu1  ;;  %v1782_v27 = vadd.f32 %v1360_v21, %v524_v11 }
 0x1f4   : > { %2089 = vtanh.f32 %v1777_v19  ;;  %v1779_v26 = vadd.f32 %v1276_v23, %v520_v12  ;;  %v1783_v36 = vadd.f32 %v1362_v24, %v528_v28 }
 0x1f5   : > { %2091 = vtanh.f32 %v1780_v18 }
 0x1f6   : > { %2093 = vtanh.f32 %v1778_v22 }
 0x1f7   : > { %2095 = vtanh.f32 %v1779_v26 }
 0x1f8   : > { %2097 = vtanh.f32 %v1782_v27 }
 0x1f9   : > { %2099 = vtanh.f32 %v1781_v29 }
 0x1fa   : > { %2101 = vtanh.f32 %v1783_v36 }
 0x1fd   : > { %v2088_v30 = vpop.eup %2087 }
 0x1fe   : > { %v1373_v31 = vmul.f32 0.5, %v2088_v30  ;;  %v2090_v32 = vpop.eup %2089 }
 0x1ff   : > { %v2092_v33 = vpop.eup %2091  ;;  %v1377_v35 = vmul.f32 0.5, %v2090_v32 }
 0x200   : > { %v1375_v34 = vadd.f32 0.5, %v1373_v31  ;;  %v2094_v37 = vpop.eup %2093 }
 0x201   : > { %v1379_v39 = vadd.f32 0.5, %v1377_v35  ;;  %v1374_v41 = vmul.f32 0.5, %v2094_v37  ;;  %v2096_v42 = vpop.eup %2095 }
 0x202   : > { %v1389_v40 = vmul.f32 %v2092_v33, %v1375_v34  ;;  %v1378_v45 = vmul.f32 0.5, %v2096_v42  ;;  %v2098_v46 = vpop.eup %2097 }
 0x203   : > { %v1387_v43 = vmul.f32 %v1385_v38, %v1379_v39  ;;  %v1376_v44 = vadd.f32 0.5, %v1374_v41  ;;  %v2100_v52 = vpop.eup %2099 }
 0x204   : > { %v1380_v49 = vadd.f32 0.5, %v1378_v45  ;;  %v1381_v54 = vmul.f32 0.5, %v2100_v52 }
 0x205   : > { %v1391_v48 = vadd.f32 %v1389_v40, %v1387_v43  ;;  %v1390_v50 = vmul.f32 %v2098_v46, %v1376_v44 }
 0x206   : > { %v1388_v51 = vmul.f32 %v1386_v47, %v1380_v49 }
 0x207   : > { %2103 = vtanh.f32 %v1391_v48  ;;  %1397 = vst [vmem:[%s372_s26] sm:$0xff] %v1391_v48 }
 0x208   : > { %v1392_v53 = vadd.f32 %v1390_v50, %v1388_v51 }
 0x20a   : > { %2105 = vtanh.f32 %v1392_v53  ;;  %1398 = vst [vmem:[%s372_s26 + $0x8] sm:$0xff] %v1392_v53 }
 0x20b   : > { %2238 = shalt.err (!%p2235_p11)
}
 0x20c   : > { %s2239_s15 = scalar_lea.hbm %s2781_s18, 256  ;;  %s2243_s29 = scalar_lea.hbm %s2874_s5, 768 }
 0x20d   : > { %p2240_p0 = scmp.ne.s32.totalorder %s2781_s18, %s2239_s15  ;;  %p2244_p13 = scmp.lt.u32.totalorder %s2781_s18, %s2874_s5 }
 0x20e   : > { %p2245_p8 = scmp.lt.u32.totalorder %s2243_s29, %s2239_s15  ;;  %p2247_p4 = scmp.lt.u32.totalorder %s2239_s15, %s2781_s18 }
 0x20f   : > { %p2241_p3 = pnand %p2240_p0, %p2910_p9 }
 0x210   : > { %p2246_p2 = por %p2245_p8, %p2244_p13 }
 0x211   : > { %p2242_p1 = pneg %p2241_p3 }
 0x212   : > { %p2248_p12 = por %p2247_p4, %p2246_p2 }
 0x214   : > { %p2249_p6 = pnand %p2248_p12, %p2242_p1 }
 0x216   : > { %2252 = shalt.err (!%p2249_p6)
}
 0x217   : > { %s2360_s11 = smov 128   ;;  %s2361_s30 = smov 384   ;;  %v2102_v55 = vpop.eup %2101  ;;  %v1383_v56 = vadd.f32 0.5, %v1381_v54 }
 0x218   : > { %s2362_s26 = smov 8   ;;  %v1382_v57 = vmul.f32 0.5, %v2102_v55  ;;  %v2104_v58 = vpop.eup %2103  ;;  %s365_s13 = scalar_lea.vmem [#allocation10], %s2621_s16 }
 0x219   : > { %1803 = dma.vmem_to_hbm [thread:$0]  (%p2910_p9), %s2774_s12, 256, %s2781_s18, %s1407_s20, %s2360_s11, %s2361_s30, %s2362_s26   ;;  %v1395_v59 = vmul.f32 %v2104_v58, %v1383_v56  ;;  %v2106_v61 = vpop.eup %2105 }
 0x21a   : > { %s1422_s25 = sshll.u32 %s365_s13, 4  ;;  %v1384_v60 = vadd.f32 0.5, %v1382_v57  ;;  %s2818_s18 = scalar_lea.hbm %s2873_s4, %s1770_s24  ;;  %s2811_s25 = int_to_ptr.vmem [resolvable:$true] %s1422_s25 }
 0x21b   : > { %1399 = vst [vmem:[%s365_s13] sm:$0xff] %v1395_v59  ;;  %s1402_s20 = scalar_lea.sflag [#allocation4], %s2618_s14  ;;  %s2253_s7 = scalar_lea.vmem %s2811_s25, 256 }
 0x21c   : > { %v1396_v62 = vmul.f32 %v2106_v61, %v1384_v60  ;;  %p2254_p10 = scmp.ne.s32.totalorder %s2811_s25, %s2253_s7  ;;  %s2363_s16 = smov [#allocation10]  }
 0x21d   : > { %s2257_s8 = sshll.u32 %s2363_s16, 4  ;;  %s2258_s8 = int_to_ptr.vmem [resolvable:$false] %s2257_s8 }
 0x21e   : > { %1400 = vst [vmem:[%s365_s13 + $0x8] sm:$0xff] %v1396_v62  ;;  %p2255_p5 = pnand %p2254_p10, %p2910_p9  ;;  %s2259_s27 = scalar_lea.vmem %s2258_s8, 512 }
 0x21f   : > { %p2260_p11 = scmp.lt.s32.totalorder %s2811_s25, %s2258_s8  ;;  %p2261_p0 = scmp.lt.s32.totalorder %s2259_s27, %s2253_s7 }
 0x220   : > { %p2256_p7 = pneg %p2255_p5 }
 0x221   : > { %p2262_p3 = por %p2261_p0, %p2260_p11 }
 0x223   : > { %p2263_p1 = pnand %p2262_p3, %p2256_p7 }
 0x225   : > { %2266 = shalt.err (!%p2263_p1)
}
 0x226   : > { %s2267_s21 = scalar_lea.hbm %s2818_s18, 256  ;;  %s2271_s10 = scalar_lea.hbm %s2873_s4, 768 }
 0x227   : > { %p2268_p13 = scmp.ne.s32.totalorder %s2818_s18, %s2267_s21  ;;  %p2272_p4 = scmp.lt.u32.totalorder %s2818_s18, %s2873_s4 }
 0x228   : > { %p2273_p12 = scmp.lt.u32.totalorder %s2271_s10, %s2267_s21  ;;  %p2275_p10 = scmp.lt.u32.totalorder %s2267_s21, %s2818_s18 }
 0x229   : > { %p2269_p8 = pnand %p2268_p13, %p2910_p9 }
 0x22a   : > { %p2274_p6 = por %p2273_p12, %p2272_p4 }
 0x22b   : > { %p2270_p2 = pneg %p2269_p8 }
 0x22c   : > { %p2276_p5 = por %p2275_p10, %p2274_p6 }
 0x22e   : > { %p2277_p7 = pnand %p2276_p5, %p2270_p2 }
 0x230   : > { %2280 = shalt.err (!%p2277_p7)
}
 0x231   : > { %1802 = dma.vmem_to_hbm [thread:$0]  (%p2910_p9), %s2811_s25, 256, %s2818_s18, %s1402_s20, %s2360_s11, %s2361_s30, %s2362_s26  }
 0x232 PF: > { %s2911_s6 = sld [smem:[#allocation18_spill]]  ;;  %s2912_s17 = sld [smem:[#allocation22_spill]] }
 0x233   : > { %p1830_p11 = scmp.ge.s32.totalorder %s2347_s23, 2 }
 0x238   : > { %s1455_s13 = sand.u32 1, %s2911_s6   ;;  %p2913_p0 = scmp.ne.s32.totalorder %s2912_s17, 0 }
 0x239   : > { %s1456_s28 = scalar_lea.sflag [#allocation4], %s1455_s13 }
 0x23a   : > { %p1821_p3 = pnand %p1830_p11, %p2913_p0 }
 0x23c   : > { %2318 = dma.done.wait (!%p1821_p3), %s1456_s28, 256  }
 0x23d   : > { %2320 = vsyncadd (!%p1821_p3), %s1456_s28, 4294967040  ;;  %s1465_s9 = scalar_lea.sflag [#allocation12], %s1455_s13 }
 0x23e   : > { %2322 = dma.done.wait (!%p1821_p3), %s1465_s9, 256  }
 0x23f   : > { %2324 = vsyncadd (!%p1821_p3), %s1465_s9, 4294967040  ;;  %s29_s23 = sadd.s32 1, %s2347_s23   ;;  %s2914_s14 = sld [smem:[#allocation19_spill]] }
 0x240   : > { %p26_p1 = scmp.ge.s32.totalorder %s29_s23, 5   ;;  %s2915_s20 = sld [smem:[#allocation21_spill]] }
 0x241   : > { %s2916_s11 = sld [smem:[#allocation20_spill]]  ;;  %s2917_s18 = smov %s2331_s19 }
 0x242   : > { %s2919_s21 = smov %s2343_s22  ;;  %28 = sbr.rel (!%p26_p1) target bundleno = 13 (0xd), region = 128 }
 0x245   : > { %s2918_s19 = smov %s2914_s14 }
 0x247   : > { %s2920_s22 = smov %s2916_s11 }
 0x249   :  { %1470 = vsyncpa [#allocation3], 1 }
 0x24a   :  { %1472 = vsyncpa [#allocation3 + $0x1], 1 }
 0x24b   :  { %1473 = vsyncpa [#allocation6], 1 }
 0x24c   :  { %1475 = vsyncpa [#allocation6 + $0x1], 1 }
 0x24d   :  { %1476 = vsyncpa [#allocation9], 1 }
 0x24e   :  { %1478 = vsyncpa [#allocation9 + $0x1], 1 }
 0x24f   :  { %1479 = vsyncpa [#allocation4], 1 }
 0x250   :  { %1481 = vsyncpa [#allocation4 + $0x1], 1 }
 0x251   :  { %1482 = vsyncpa [#allocation12], 1 }
 0x252   :  { %1484 = vsyncpa [#allocation12 + $0x1], 1 }

</bundles_post_ra>
